<compile_context>
chip_gen: v7x
topology: tpu7x:2x2x1
jax: 0.10.0
libtpu: 0.0.40
codegen_flags: <defaults>
</compile_context>

<pallas_src>
import functools

import jax
import jax.numpy as jnp
from jax.experimental import pallas as pl
from jax.experimental.pallas import tpu as pltpu


def _ncf_kernel(uidx_ref, iidx_ref,                    # scalar prefetch (SMEM): (B,) int32
                utab_hbm, itab_hbm,                    # embedding tables, left in HBM
                w1t_ref, b1_ref, w2t_ref, b2_ref, w3_ref,   # small VMEM-resident weights
                out_ref, ue_ref, ie_ref,               # outputs: (bt,1), (bt,K), (bt,K)
                ue_buf, ie_buf, sem):                  # scratch: gather buffers + DMA sems
    """One batch tile; all activations are (batch_tile, features)."""
    bt, k = ue_buf.shape
    cdt = w1t_ref.dtype                   # MXU operand dtype (f32 or bf16)
    base = pl.program_id(0) * bt          # offset into the full (B,) index vectors

    # ---- embedding row gather: HBM -> VMEM, one small DMA per row ------------
    # O(bt*K) bytes per tile regardless of vocab size; tables never touch VMEM
    # as a whole (replaces the O(vocab * bt) one-hot matmul of the old version).
    @pl.loop(0, bt)
    def _issue(b):
        u = uidx_ref[base + b]
        i = iidx_ref[base + b]
        pltpu.make_async_copy(utab_hbm.at[pl.ds(u, 1), :],
                              ue_buf.at[pl.ds(b, 1), :], sem.at[0]).start()
        pltpu.make_async_copy(itab_hbm.at[pl.ds(i, 1), :],
                              ie_buf.at[pl.ds(b, 1), :], sem.at[1]).start()

    # All row copies share a semaphore and have identical shape, so waiting bt
    # times with a same-shaped descriptor drains them (paged-attention pattern).
    @pl.loop(0, bt)
    def _drain(b):
        del b
        pltpu.make_async_copy(utab_hbm.at[pl.ds(0, 1), :],
                              ue_buf.at[pl.ds(0, 1), :], sem.at[0]).wait()
        pltpu.make_async_copy(itab_hbm.at[pl.ds(0, 1), :],
                              ie_buf.at[pl.ds(0, 1), :], sem.at[1]).wait()

    ue = ue_buf[...]                      # (bt, K) f32 — exact embedding rows
    ie = ie_buf[...]
    ue_ref[...] = ue                      # embeddings are returned exactly (f32),
    ie_ref[...] = ie                      # independent of compute_dtype

    # ---- MLP: fused layer-1 matmul on the concat, f32 accumulation -----------
    z = jnp.concatenate([ue, ie], axis=1).astype(cdt)             # (bt, 2K)
    h1 = jnp.dot(z, w1t_ref[...],
                 preferred_element_type=jnp.float32) + b1_ref[...]
    h1 = jnp.maximum(h1, 0.0)                                     # (bt, K) f32
    h2 = jnp.dot(h1.astype(cdt), w2t_ref[...],
                 preferred_element_type=jnp.float32) + b2_ref[...]
    h2 = jnp.maximum(h2, 0.0)                                     # (bt, K2) f32
    # linear_3 (K2 -> 1, no bias): VPU multiply + lane reduction; the (bt, 1)
    # store is only bt floats per tile, so its narrow width is irrelevant.
    out_ref[...] = jnp.sum(h2 * w3_ref[...], axis=1, keepdims=True)


@functools.partial(jax.jit, static_argnames=("batch_tile", "compute_dtype"))
def ncf_forward(x, params, *, batch_tile=128, compute_dtype=jnp.float32):
    """x: (B, 2) int32 rows of (user_idx, item_idx).

    Returns (out (B,1), user_embed (B,K), item_embed (B,K)), matching the
    PyTorch NCF.forward.  batch_tile=256 is a good choice on v6e for larger
    batches; keep B/batch_tile >= 2 (ideally >= 4) on v7x so both TensorCores
    get work.
    """
    user_table, item_table, w1, b1, w2, b2, w3 = params
    B = x.shape[0]
    U, K = user_table.shape
    I = item_table.shape[0]
    K2 = w2.shape[0]
    # TODO(synk): arbitrary batch sizes need caller-side padding; there is no
    # remainder-tile masking in the kernel.
    assert B % batch_tile == 0, "batch must be a multiple of batch_tile"

    cdt = compute_dtype
    # Clamp indices so the row-gather DMA stays in bounds (PyTorch nn.Embedding
    # would raise on out-of-range ids; an unclamped OOB DMA would fault).
    uidx = jnp.clip(x[:, 0].astype(jnp.int32), 0, U - 1)
    iidx = jnp.clip(x[:, 1].astype(jnp.int32), 0, I - 1)

    # Weight layouts for right-multiplication by (batch, features) activations.
    w1t = w1.T.astype(cdt)                       # (2K, K)  fused layer-1 weight
    b1r = b1.reshape(1, K).astype(jnp.float32)
    w2t = w2.T.astype(cdt)                       # (K, K2)
    b2r = b2.reshape(1, K2).astype(jnp.float32)
    w3r = w3.reshape(1, K2).astype(jnp.float32)  # final layer stays on the VPU

    grid = (B // batch_tile,)
    # index_maps receive the two scalar-prefetch refs as trailing args.
    tile = lambda i, *_: (i, 0)
    full = lambda i, *_: (0, 0)

    # Tight VMEM budget: tiny constant weight blocks (x2 default buffering),
    # streaming output tiles x2, gather scratch, plus fixed slack.
    itemsize = jnp.dtype(cdt).itemsize
    const_bytes = (2 * K * K + K * K2) * itemsize + (K + 2 * K2) * 4
    stream_bytes = batch_tile * (1 + 2 * K) * 4
    scratch_bytes = 2 * batch_tile * K * 4
    vmem_limit = 2 * (const_bytes + stream_bytes) + scratch_bytes + (2 << 20)
    vmem_limit = int(min(max(vmem_limit, 4 << 20), 64 << 20))

    out_shapes = (
        jax.ShapeDtypeStruct((B, 1), jnp.float32),   # logits
        jax.ShapeDtypeStruct((B, K), jnp.float32),   # user_embed (exact rows)
        jax.ShapeDtypeStruct((B, K), jnp.float32),   # item_embed (exact rows)
    )

    return pl.pallas_call(
        _ncf_kernel,
        out_shape=out_shapes,
        grid_spec=pltpu.PrefetchScalarGridSpec(
            num_scalar_prefetch=2,
            grid=grid,
            in_specs=[
                pl.BlockSpec(memory_space=pl.ANY),   # user table (U, K), HBM
                pl.BlockSpec(memory_space=pl.ANY),   # item table (I, K), HBM
                pl.BlockSpec((2 * K, K), full),      # W1^T (fused)
                pl.BlockSpec((1, K), full),          # b1
                pl.BlockSpec((K, K2), full),         # W2^T
                pl.BlockSpec((1, K2), full),         # b2
                pl.BlockSpec((1, K2), full),         # w3 row
            ],
            out_specs=[
                pl.BlockSpec((batch_tile, 1), tile),
                pl.BlockSpec((batch_tile, K), tile),
                pl.BlockSpec((batch_tile, K), tile),
            ],
            scratch_shapes=[
                pltpu.VMEM((batch_tile, K), jnp.float32),   # gathered user rows
                pltpu.VMEM((batch_tile, K), jnp.float32),   # gathered item rows
                pltpu.SemaphoreType.DMA((2,)),
            ]),
        compiler_params=pltpu.CompilerParams(
            dimension_semantics=("parallel",),       # batch tiles shard across TCs
            vmem_limit_bytes=vmem_limit),
    )(uidx, iidx,
      user_table.astype(jnp.float32), item_table.astype(jnp.float32),
      w1t, b1r, w2t, b2r, w3r)


def init_params(key, num_users, num_items, embedding_k):
    """Deterministic synthetic init; shapes/layout match the PyTorch module."""
    k = embedding_k
    k2 = k // 2
    keys = jax.random.split(key, 7)

    def lin_init(kw, fan_in, shape):
        bound = 1.0 / jnp.sqrt(fan_in)
        return jax.random.uniform(kw, shape, jnp.float32, -bound, bound)

    user_table = jax.random.normal(keys[0], (num_users, k), jnp.float32)
    item_table = jax.random.normal(keys[1], (num_items, k), jnp.float32)
    w1 = lin_init(keys[2], 2 * k, (k, 2 * k))    # nn.Linear (out, in) layout
    b1 = lin_init(keys[3], 2 * k, (k,))
    w2 = lin_init(keys[4], k, (k2, k))
    b2 = lin_init(keys[5], k, (k2,))
    w3 = lin_init(keys[6], k2, (1, k2))          # linear_3 has no bias
    return (user_table, item_table, w1, b1, w2, b2, w3)


def ncf_reference(x, params):
    """Pure-JAX reference mirroring the PyTorch forward (f32)."""
    user_table, item_table, w1, b1, w2, b2, w3 = params
    ue = user_table[x[:, 0]]
    ie = item_table[x[:, 1]]
    z = jnp.concatenate([ue, ie], axis=1)
    h1 = jax.nn.relu(z @ w1.T + b1)
    h2 = jax.nn.relu(h1 @ w2.T + b2)
    out = h2 @ w3.T
    return out, ue, ie


if __name__ == "__main__":
    num_users, num_items, embedding_k = 48, 64, 32
    batch = 512          # 4 grid steps of 128 -> both v7x TensorCores stay busy

    key = jax.random.PRNGKey(0)
    k_param, k_u, k_i = jax.random.split(key, 3)
    params = init_params(k_param, num_users, num_items, embedding_k)

    uid = jax.random.randint(k_u, (batch,), 0, num_users, jnp.int32)
    iid = jax.random.randint(k_i, (batch,), 0, num_items, jnp.int32)
    x = jnp.stack([uid, iid], axis=1)            # (B, 2) int32

    ref_out, ref_ue, ref_ie = ncf_reference(x, params)

    # f32 MXU operands: near-exact MLP, bit-exact embeddings (DMA gather).
    out, ue, ie = jax.block_until_ready(
        ncf_forward(x, params, compute_dtype=jnp.float32))
    assert jnp.allclose(out, ref_out, atol=1e-4, rtol=1e-4)
    assert jnp.array_equal(ue, ref_ue)
    assert jnp.array_equal(ie, ref_ie)

    # bf16 MXU operands + f32 accumulation (recommended on v6e / v7x);
    # embeddings stay exact f32 because the gather is dtype-agnostic.
    out_bf, ue_bf, ie_bf = jax.block_until_ready(
        ncf_forward(x, params, compute_dtype=jnp.bfloat16))
    assert jnp.allclose(out_bf, ref_out, atol=5e-2, rtol=5e-2)
    assert jnp.array_equal(ue_bf, ref_ue)
    assert jnp.array_equal(ie_bf, ref_ie)

    print("KERNEL_OK")
</pallas_src>

<mosaic_0001>
module attributes {stable_mosaic.version = 11 : i64} {
  func.func @_ncf_kernel(%arg0: i32, %arg1: memref<512xi32, #tpu.memory_space<smem>>, %arg2: memref<512xi32, #tpu.memory_space<smem>>, %arg3: memref<48x32xf32, #tpu.memory_space<any>>, %arg4: memref<64x32xf32, #tpu.memory_space<any>>, %arg5: memref<64x32xf32, #tpu.memory_space<vmem>>, %arg6: memref<1x32xf32, #tpu.memory_space<vmem>>, %arg7: memref<32x16xf32, #tpu.memory_space<vmem>>, %arg8: memref<1x16xf32, #tpu.memory_space<vmem>>, %arg9: memref<1x16xf32, #tpu.memory_space<vmem>>, %arg10: memref<128x1xf32, #tpu.memory_space<vmem>>, %arg11: memref<128x32xf32, #tpu.memory_space<vmem>>, %arg12: memref<128x32xf32, #tpu.memory_space<vmem>>, %arg13: memref<128x32xf32, #tpu.memory_space<vmem>>, %arg14: memref<128x32xf32, #tpu.memory_space<vmem>>, %arg15: memref<2x!tpu.dma_semaphore, #tpu.memory_space<semaphore_mem>>) attributes {dimension_semantics = [#tpu.dimension_semantics<parallel>], iteration_bounds = array<i64: 4>, scalar_prefetch = 2 : i64, scratch_operands = 3 : i64, tpu.core_type = #tpu.core_type<tc>, window_params = [{}, {}, {pipeline_mode = #tpu.pipeline_mode<synchronous>, transform_indices = @transform_2, window_bounds = array<i64: 64, 32>}, {pipeline_mode = #tpu.pipeline_mode<synchronous>, transform_indices = @transform_3, window_bounds = array<i64: 1, 32>}, {pipeline_mode = #tpu.pipeline_mode<synchronous>, transform_indices = @transform_4, window_bounds = array<i64: 32, 16>}, {pipeline_mode = #tpu.pipeline_mode<synchronous>, transform_indices = @transform_5, window_bounds = array<i64: 1, 16>}, {pipeline_mode = #tpu.pipeline_mode<synchronous>, transform_indices = @transform_6, window_bounds = array<i64: 1, 16>}, {transform_indices = @transform_7, window_bounds = array<i64: 128, 1>}, {transform_indices = @transform_8, window_bounds = array<i64: 128, 32>}, {transform_indices = @transform_9, window_bounds = array<i64: 128, 32>}]} {
    %c128_i32 = arith.constant 128 : i32
    %0 = arith.muli %arg0, %c128_i32 : i32
    %c0_i32 = arith.constant 0 : i32
    %c128_i32_0 = arith.constant 128 : i32
    %1 = arith.addi %c0_i32, %c128_i32_0 : i32
    %c1_i32 = arith.constant 1 : i32
    scf.for %arg16 = %c0_i32 to %1 step %c1_i32  : i32 {
      %c1_i32_28 = arith.constant 1 : i32
      %28 = arith.muli %arg16, %c1_i32_28 : i32
      %c0_i32_29 = arith.constant 0 : i32
      %29 = arith.addi %c0_i32_29, %28 : i32
      %30 = arith.addi %0, %29 : i32
      %31 = arith.index_cast %30 : i32 to index
      %32 = memref.load %arg1[%31] : memref<512xi32, #tpu.memory_space<smem>>
      %33 = arith.addi %0, %29 : i32
      %34 = arith.index_cast %33 : i32 to index
      %35 = memref.load %arg2[%34] : memref<512xi32, #tpu.memory_space<smem>>
      %c0_i32_30 = arith.constant 0 : i32
      %c0_i32_31 = arith.constant 0 : i32
      %36 = tpu.memref_slice %arg3[%32, %c0_i32_31] : memref<48x32xf32, #tpu.memory_space<any>> -> memref<1x32xf32, #tpu.memory_space<any>>
      %c0_i32_32 = arith.constant 0 : i32
      %37 = tpu.memref_slice %arg13[%29, %c0_i32_32] : memref<128x32xf32, #tpu.memory_space<vmem>> -> memref<1x32xf32, #tpu.memory_space<vmem>>
      %38 = tpu.memref_slice %arg15[%c0_i32_30] : memref<2x!tpu.dma_semaphore, #tpu.memory_space<semaphore_mem>> -> memref<1x!tpu.dma_semaphore, #tpu.memory_space<semaphore_mem>>
      %39 = tpu.memref_squeeze %38 : memref<1x!tpu.dma_semaphore, #tpu.memory_space<semaphore_mem>> -> memref<!tpu.dma_semaphore, #tpu.memory_space<semaphore_mem>>
      tpu.enqueue_dma source(%36 : memref<1x32xf32, #tpu.memory_space<any>>) target(%37 : memref<1x32xf32, #tpu.memory_space<vmem>>) target_semaphore(%39 : memref<!tpu.dma_semaphore, #tpu.memory_space<semaphore_mem>>)
      %c1_i32_33 = arith.constant 1 : i32
      %c0_i32_34 = arith.constant 0 : i32
      %40 = tpu.memref_slice %arg4[%35, %c0_i32_34] : memref<64x32xf32, #tpu.memory_space<any>> -> memref<1x32xf32, #tpu.memory_space<any>>
      %c0_i32_35 = arith.constant 0 : i32
      %41 = tpu.memref_slice %arg14[%29, %c0_i32_35] : memref<128x32xf32, #tpu.memory_space<vmem>> -> memref<1x32xf32, #tpu.memory_space<vmem>>
      %42 = tpu.memref_slice %arg15[%c1_i32_33] : memref<2x!tpu.dma_semaphore, #tpu.memory_space<semaphore_mem>> -> memref<1x!tpu.dma_semaphore, #tpu.memory_space<semaphore_mem>>
      %43 = tpu.memref_squeeze %42 : memref<1x!tpu.dma_semaphore, #tpu.memory_space<semaphore_mem>> -> memref<!tpu.dma_semaphore, #tpu.memory_space<semaphore_mem>>
      tpu.enqueue_dma source(%40 : memref<1x32xf32, #tpu.memory_space<any>>) target(%41 : memref<1x32xf32, #tpu.memory_space<vmem>>) target_semaphore(%43 : memref<!tpu.dma_semaphore, #tpu.memory_space<semaphore_mem>>)
    }
    %c128_i32_1 = arith.constant 128 : i32
    %c0_i32_2 = arith.constant 0 : i32
    %c128_i32_3 = arith.constant 128 : i32
    %2 = arith.addi %c0_i32_2, %c128_i32_3 : i32
    %c1_i32_4 = arith.constant 1 : i32
    scf.for %arg16 = %c0_i32_2 to %2 step %c1_i32_4  : i32 {
      %c0_i32_28 = arith.constant 0 : i32
      %c0_i32_29 = arith.constant 0 : i32
      %c0_i32_30 = arith.constant 0 : i32
      %28 = tpu.memref_slice %arg3[%c0_i32_29, %c0_i32_30] : memref<48x32xf32, #tpu.memory_space<any>> -> memref<1x32xf32, #tpu.memory_space<any>>
      %c0_i32_31 = arith.constant 0 : i32
      %c0_i32_32 = arith.constant 0 : i32
      %29 = tpu.memref_slice %arg13[%c0_i32_31, %c0_i32_32] : memref<128x32xf32, #tpu.memory_space<vmem>> -> memref<1x32xf32, #tpu.memory_space<vmem>>
      %30 = tpu.memref_slice %arg15[%c0_i32_28] : memref<2x!tpu.dma_semaphore, #tpu.memory_space<semaphore_mem>> -> memref<1x!tpu.dma_semaphore, #tpu.memory_space<semaphore_mem>>
      %31 = tpu.memref_squeeze %30 : memref<1x!tpu.dma_semaphore, #tpu.memory_space<semaphore_mem>> -> memref<!tpu.dma_semaphore, #tpu.memory_space<semaphore_mem>>
      tpu.wait_dma2 semaphore(%31 : memref<!tpu.dma_semaphore, #tpu.memory_space<semaphore_mem>>) src(%28 : memref<1x32xf32, #tpu.memory_space<any>>) dst(%29 : memref<1x32xf32, #tpu.memory_space<vmem>>)
      %c1_i32_33 = arith.constant 1 : i32
      %c0_i32_34 = arith.constant 0 : i32
      %c0_i32_35 = arith.constant 0 : i32
      %32 = tpu.memref_slice %arg4[%c0_i32_34, %c0_i32_35] : memref<64x32xf32, #tpu.memory_space<any>> -> memref<1x32xf32, #tpu.memory_space<any>>
      %c0_i32_36 = arith.constant 0 : i32
      %c0_i32_37 = arith.constant 0 : i32
      %33 = tpu.memref_slice %arg14[%c0_i32_36, %c0_i32_37] : memref<128x32xf32, #tpu.memory_space<vmem>> -> memref<1x32xf32, #tpu.memory_space<vmem>>
      %34 = tpu.memref_slice %arg15[%c1_i32_33] : memref<2x!tpu.dma_semaphore, #tpu.memory_space<semaphore_mem>> -> memref<1x!tpu.dma_semaphore, #tpu.memory_space<semaphore_mem>>
      %35 = tpu.memref_squeeze %34 : memref<1x!tpu.dma_semaphore, #tpu.memory_space<semaphore_mem>> -> memref<!tpu.dma_semaphore, #tpu.memory_space<semaphore_mem>>
      tpu.wait_dma2 semaphore(%35 : memref<!tpu.dma_semaphore, #tpu.memory_space<semaphore_mem>>) src(%32 : memref<1x32xf32, #tpu.memory_space<any>>) dst(%33 : memref<1x32xf32, #tpu.memory_space<vmem>>)
    }
    %c0 = arith.constant 0 : index
    %c0_5 = arith.constant 0 : index
    %3 = vector.load %arg13[%c0, %c0_5] : memref<128x32xf32, #tpu.memory_space<vmem>>, vector<128x32xf32>
    %c0_6 = arith.constant 0 : index
    %c0_7 = arith.constant 0 : index
    %4 = vector.load %arg14[%c0_6, %c0_7] : memref<128x32xf32, #tpu.memory_space<vmem>>, vector<128x32xf32>
    %c0_8 = arith.constant 0 : index
    %c0_9 = arith.constant 0 : index
    %5 = vector.load %arg11[%c0_8, %c0_9] : memref<128x32xf32, #tpu.memory_space<vmem>>, vector<128x32xf32>
    tpu.vector_store %arg11[%c0_8, %c0_9], %3 {strides = array<i32>} : memref<128x32xf32, #tpu.memory_space<vmem>>, vector<128x32xf32>,
    %c0_10 = arith.constant 0 : index
    %c0_11 = arith.constant 0 : index
    %6 = vector.load %arg12[%c0_10, %c0_11] : memref<128x32xf32, #tpu.memory_space<vmem>>, vector<128x32xf32>
    tpu.vector_store %arg12[%c0_10, %c0_11], %4 {strides = array<i32>} : memref<128x32xf32, #tpu.memory_space<vmem>>, vector<128x32xf32>,
    %7 = tpu.concatenate %3, %4 in 1 : vector<128x32xf32>, vector<128x32xf32> -> vector<128x64xf32>
    %c0_12 = arith.constant 0 : index
    %c0_13 = arith.constant 0 : index
    %8 = vector.load %arg5[%c0_12, %c0_13] : memref<64x32xf32, #tpu.memory_space<vmem>>, vector<64x32xf32>
    %cst = arith.constant dense<0.000000e+00> : vector<128x32xf32>
    %9 = tpu.matmul %7, %8, %cst {dimension_numbers = #tpu.dot_dimension_numbers<[1], [0], [0], [1], [0, 0, 1, 1], [], []>} : vector<128x64xf32>, vector<64x32xf32>, vector<128x32xf32> -> vector<128x32xf32>
    %c0_14 = arith.constant 0 : index
    %c0_15 = arith.constant 0 : index
    %10 = vector.load %arg6[%c0_14, %c0_15] : memref<1x32xf32, #tpu.memory_space<vmem>>, vector<1x32xf32>
    %11 = vector.broadcast %10 : vector<1x32xf32> to vector<128x32xf32>
    %12 = arith.addf %9, %11 : vector<128x32xf32>
    %cst_16 = arith.constant 0.000000e+00 : f32
    %13 = vector.broadcast %cst_16 : f32 to vector<128x32xf32>
    %14 = arith.maximumf %12, %13 : vector<128x32xf32>
    %c0_17 = arith.constant 0 : index
    %c0_18 = arith.constant 0 : index
    %15 = vector.load %arg7[%c0_17, %c0_18] : memref<32x16xf32, #tpu.memory_space<vmem>>, vector<32x16xf32>
    %cst_19 = arith.constant dense<0.000000e+00> : vector<128x16xf32>
    %16 = tpu.matmul %14, %15, %cst_19 {dimension_numbers = #tpu.dot_dimension_numbers<[1], [0], [0], [1], [0, 0, 1, 1], [], []>} : vector<128x32xf32>, vector<32x16xf32>, vector<128x16xf32> -> vector<128x16xf32>
    %c0_20 = arith.constant 0 : index
    %c0_21 = arith.constant 0 : index
    %17 = vector.load %arg8[%c0_20, %c0_21] : memref<1x16xf32, #tpu.memory_space<vmem>>, vector<1x16xf32>
    %18 = vector.broadcast %17 : vector<1x16xf32> to vector<128x16xf32>
    %19 = arith.addf %16, %18 : vector<128x16xf32>
    %cst_22 = arith.constant 0.000000e+00 : f32
    %20 = vector.broadcast %cst_22 : f32 to vector<128x16xf32>
    %21 = arith.maximumf %19, %20 : vector<128x16xf32>
    %c0_23 = arith.constant 0 : index
    %c0_24 = arith.constant 0 : index
    %22 = vector.load %arg9[%c0_23, %c0_24] : memref<1x16xf32, #tpu.memory_space<vmem>>, vector<1x16xf32>
    %23 = vector.broadcast %22 : vector<1x16xf32> to vector<128x16xf32>
    %24 = arith.mulf %21, %23 : vector<128x16xf32>
    %cst_25 = arith.constant dense<0.000000e+00> : vector<128xf32>
    %25 = vector.multi_reduction <add>, %24, %cst_25 [1] : vector<128x16xf32> to vector<128xf32>
    %26 = vector.shape_cast %25 : vector<128xf32> to vector<128x1xf32>
    %c0_26 = arith.constant 0 : index
    %c0_27 = arith.constant 0 : index
    %27 = vector.load %arg10[%c0_26, %c0_27] : memref<128x1xf32, #tpu.memory_space<vmem>>, vector<128x1xf32>
    tpu.vector_store %arg10[%c0_26, %c0_27], %26 {strides = array<i32>} : memref<128x1xf32, #tpu.memory_space<vmem>>, vector<128x1xf32>,
    return
  }
  func.func @transform_2(%arg0: i32, %arg1: memref<512xi32, #tpu.memory_space<smem>>, %arg2: memref<512xi32, #tpu.memory_space<smem>>) -> (i32, i32) {
    %c0_i32 = arith.constant 0 : i32
    %c0_i32_0 = arith.constant 0 : i32
    %c0_i32_1 = arith.constant 0 : i32
    return %c0_i32, %c0_i32_0 : i32, i32
  }
  func.func @transform_3(%arg0: i32, %arg1: memref<512xi32, #tpu.memory_space<smem>>, %arg2: memref<512xi32, #tpu.memory_space<smem>>) -> (i32, i32) {
    %c0_i32 = arith.constant 0 : i32
    %c0_i32_0 = arith.constant 0 : i32
    %c0_i32_1 = arith.constant 0 : i32
    return %c0_i32, %c0_i32_0 : i32, i32
  }
  func.func @transform_4(%arg0: i32, %arg1: memref<512xi32, #tpu.memory_space<smem>>, %arg2: memref<512xi32, #tpu.memory_space<smem>>) -> (i32, i32) {
    %c0_i32 = arith.constant 0 : i32
    %c0_i32_0 = arith.constant 0 : i32
    %c0_i32_1 = arith.constant 0 : i32
    return %c0_i32, %c0_i32_0 : i32, i32
  }
  func.func @transform_5(%arg0: i32, %arg1: memref<512xi32, #tpu.memory_space<smem>>, %arg2: memref<512xi32, #tpu.memory_space<smem>>) -> (i32, i32) {
    %c0_i32 = arith.constant 0 : i32
    %c0_i32_0 = arith.constant 0 : i32
    %c0_i32_1 = arith.constant 0 : i32
    return %c0_i32, %c0_i32_0 : i32, i32
  }
  func.func @transform_6(%arg0: i32, %arg1: memref<512xi32, #tpu.memory_space<smem>>, %arg2: memref<512xi32, #tpu.memory_space<smem>>) -> (i32, i32) {
    %c0_i32 = arith.constant 0 : i32
    %c0_i32_0 = arith.constant 0 : i32
    %c0_i32_1 = arith.constant 0 : i32
    return %c0_i32, %c0_i32_0 : i32, i32
  }
  func.func @transform_7(%arg0: i32, %arg1: memref<512xi32, #tpu.memory_space<smem>>, %arg2: memref<512xi32, #tpu.memory_space<smem>>) -> (i32, i32) {
    %c0_i32 = arith.constant 0 : i32
    %c0_i32_0 = arith.constant 0 : i32
    return %arg0, %c0_i32 : i32, i32
  }
  func.func @transform_8(%arg0: i32, %arg1: memref<512xi32, #tpu.memory_space<smem>>, %arg2: memref<512xi32, #tpu.memory_space<smem>>) -> (i32, i32) {
    %c0_i32 = arith.constant 0 : i32
    %c0_i32_0 = arith.constant 0 : i32
    return %arg0, %c0_i32 : i32, i32
  }
  func.func @transform_9(%arg0: i32, %arg1: memref<512xi32, #tpu.memory_space<smem>>, %arg2: memref<512xi32, #tpu.memory_space<smem>>) -> (i32, i32) {
    %c0_i32 = arith.constant 0 : i32
    %c0_i32_0 = arith.constant 0 : i32
    return %arg0, %c0_i32 : i32, i32
  }
}

</mosaic_0001>

<bundles_post_ra>
// kernel: ncf_forward.1
= control target key start
LH: loop header
LB: loop body
LE: loop exit
PB: predicated region body
PF: predicated region fallthrough
CT: control target
= control target key end

     0   :  { %s1979_s0 = inlined_call_operand.vmem [shape: s32[512], index: 0, kind: input, shape index: {}]   ;;  %s1980_s2 = inlined_call_operand.vmem [shape: f32[48,32], index: 2, kind: input, shape index: {}]   ;;  %s1981_s3 = inlined_call_operand.vmem [shape: f32[64,32], index: 3, kind: input, shape index: {}]   ;;  %s1982_s4 = inlined_call_operand.vmem [shape: f32[64,32], index: 4, kind: input, shape index: {}]   ;;  %s1983_s5 = inlined_call_operand.vmem [shape: f32[1,32], index: 5, kind: input, shape index: {}]   ;;  %s1984_s6 = inlined_call_operand.vmem [shape: f32[32,16], index: 6, kind: input, shape index: {}]   ;;  %s1985_s7 = inlined_call_operand.vmem [shape: f32[1,16], index: 7, kind: input, shape index: {}]   ;;  %s1986_s8 = inlined_call_operand.vmem [shape: f32[1,16], index: 8, kind: input, shape index: {}]   ;;  %s1987_s9 = inlined_call_operand.vmem [shape: f32[512,1], index: 9, kind: output, shape index: {0}]   ;;  %s1988_s10 = inlined_call_operand.vmem [shape: f32[512,32], index: 10, kind: output, shape index: {1}]   ;;  %s1989_s11 = inlined_call_operand.vmem [shape: f32[512,32], index: 11, kind: output, shape index: {2}]   ;;  %s1990_s1 = inlined_call_operand.vmem [shape: s32[512], index: 1, kind: input, shape index: {}]  }
   0x1   :  { %s17_s19 = sshll.u32 %s1979_s0, 4  ;;  %s21_s22 = sshll.u32 %s1990_s1, 4  ;;  %s18_s19 = int_to_ptr.vmem [resolvable:$true] %s17_s19  ;;  %s22_s22 = int_to_ptr.vmem [resolvable:$true] %s21_s22 }
   0x2   :  { %s1471_s23 = scalar_lea.vmem %s18_s19, 64  ;;  %p1476_p1 = scmp.lt.s32.totalorder %s18_s19, %s18_s19 }
   0x3   :  { %p1472_p0 = scmp.ne.s32.totalorder %s18_s19, %s1471_s23  ;;  %p1477_p2 = scmp.lt.s32.totalorder %s1471_s23, %s1471_s23 }
   0x5   :  { %p1478_p3 = por %p1477_p2, %p1476_p1 }
   0x7   :  { %p1479_p4 = pnand %p1478_p3, %p1472_p0 }
   0x9   :  { %1482 = shalt.err (!%p1479_p4)  }
   0xa   :  { %s1525_s24 = smov [#allocation6]   ;;  %s1483_s25 = scalar_lea.vmem %s22_s22, 64 }
   0xb   :  { %20 = dma.vmem_to_smem %s18_s19, 64, %s1525_s24, [#allocation5] }
   0xc   :  { %p1484_p5 = scmp.ne.s32.totalorder %s22_s22, %s1483_s25  ;;  %p1488_p6 = scmp.lt.s32.totalorder %s22_s22, %s22_s22 }
   0xd   :  { %p1489_p7 = scmp.lt.s32.totalorder %s1483_s25, %s1483_s25 }
   0xf   :  { %p1490_p8 = por %p1489_p7, %p1488_p6 }
  0x11   :  { %p1491_p9 = pnand %p1490_p8, %p1484_p5 }
  0x13   :  { %1494 = shalt.err (!%p1491_p9)  }
  0x14   :  { %s1526_s0 = smov [#allocation7]  }
  0x15   :  { %24 = dma.vmem_to_smem %s22_s22, 64, %s1526_s0, [#allocation5] }
  0x16   :  { %1507 = dma.done.wait [#allocation5], 128 }
  0x17   :  { %1508 = vsyncadd [#allocation5], 4294967168 }
  0x18   :  { %26 = sfence }
  0x19   :  { %s1594_s1 = smov 0  }
  0x1a LB: > { %s1254_s26 = sadd.s32 4294967295, %s1515_s1   ;;  %p1257_p10 = scmp.ge.s32.totalorder %s1515_s1, 1  ;;  %s1515_s1 = sphi %s1594_s1, %s32_s1  }
  0x1b   : > { %p246_p11 = scmp.lt.s32.totalorder %s1515_s1, 5 }
  0x1d   : > { %p247_p12 = pnand %p1257_p10, %p246_p11 }
  0x1e   : > { %s1258_s27 = sshll.u32 (!%p247_p12), %s1254_s26, 4  ;;  %s1264_s28 = sshll.u32 (!%p247_p12), %s1254_s26, 7 }
  0x1f   : > { %250 = sbr.rel (%p247_p12) target bundleno = 804 (0x324), region = 40  ;;  %p284_p13 = scmp.lt.s32.totalorder (!%p247_p12), %s1258_s27, 63 }
  0x20   : > { %s1517_s20 = smov (!%p247_p12), 0  }
  0x26   : > { %s1992_s27 = smov (!%p284_p13, %s1258_s27), 63 }
  0x27   : > { %s1259_s29 = sshll.u32 %s1992_s27, 3 }
  0x28   : > { %s1605_s13 = scalar_lea.vmem %s1987_s9, %s1259_s29  ;;  %s1610_s16 = scalar_lea.vmem %s1988_s10, %s1259_s29 }
  0x29   : > { %s1615_s19 = scalar_lea.vmem %s1989_s11, %s1259_s29 }
  0x2a LB: >> { %s308_s21 = sadd.s32 %s1519_s20, %s1264_s28  ;;  %s312_s26 = scalar_lea.vmem [#allocation2], %s1519_s20  ;;  %s1519_s20 = sphi %s1517_s20, %s307_s20  }
  0x2b   : >> { %s309_s22 = sld [smem:[#allocation6 + %s308_s21]] }
  0x2c   : >> { %s310_s23 = sld [smem:[#allocation7 + %s308_s21]] }
  0x31   : >> { %s311_s0 = scalar_lea.vmem %s1980_s2, %s309_s22 }
  0x32   : >> { %v330_v0 = vld [vmem:[%s311_s0] sm:$0x1] }
  0x33   : >> { %331 = vst [vmem:[%s312_s26] sm:$0x1] %v330_v0 }
  0x34   : >> { %356 = vsyncadd [#allocation4], 16  ;;  %s357_s29 = scalar_lea.vmem %s1981_s3, %s310_s23  ;;  %s358_s12 = scalar_lea.vmem [#allocation3], %s1519_s20 }
  0x35   : >> { %v377_v1 = vld [vmem:[%s357_s29] sm:$0x1] }
  0x36   : >> { %378 = vst [vmem:[%s358_s12] sm:$0x1] %v377_v1 }
  0x37   : >> { %403 = vsyncadd [#allocation4 + $0x1], 16  ;;  %s307_s20 = sadd.s32 1, %s1519_s20  }
  0x38   : >> { %p304_p0 = scmp.ge.s32.totalorder %s307_s20, 128  }
  0x39   : > { %s1521_s14 = smov (%p304_p0), 0  }
  0x3a   : > { %306 = sbr.rel (!%p304_p0) target bundleno = 42 (0x2a), region = 192 }
  0x41 LB: >> { %1509 = dma.done.wait [#allocation4], 16  ;;  %s1523_s14 = sphi %s1521_s14, %s409_s14  }
  0x42   : >> { %1510 = vsyncadd [#allocation4], 4294967280 }
  0x43   : >> { %1511 = dma.done.wait [#allocation4 + $0x1], 16 }
  0x44   : >> { %1512 = vsyncadd [#allocation4 + $0x1], 4294967280  ;;  %s409_s14 = sadd.s32 1, %s1523_s14  }
  0x45   : >> { %p406_p1 = scmp.ge.s32.totalorder %s409_s14, 128  }
  0x46   : > { %v432_v2 = vld [vmem:[#allocation3] sm:$0xff] (%p406_p1)  ;;  %vm448_vm0 = vcmask (%p406_p1), 261120   ;;  %v434_v3 = vld [vmem:[#allocation3 + $0x10] sm:$0xff] (%p406_p1)  ;;  %v433_v4 = vld [vmem:[#allocation3 + $0x8] sm:$0xff] (%p406_p1)  ;;  %s1527_s28 = smov (%p406_p1), 32   ;;  %vm576_vm1 = vcmask (%p406_p1), 523264  }
  0x47   : > { %408 = sbr.rel (!%p406_p1) target bundleno = 65 (0x41), region = 203  ;;  %497 = vrot.lane.b32.xlu0 (%p406_p1), %v432_v2, %s1527_s28  ;;  %465 = vst.msk [vmem:[%s1615_s19] sm:$0xff] (%p406_p1), %vm448_vm0, %v432_v2  ;;  %501 = vrot.lane.b32.xlu1 (%p406_p1), %v434_v3, %s1527_s28  ;;  %467 = vst.msk [vmem:[%s1615_s19 + $0x10] sm:$0xff] (%p406_p1), %vm448_vm0, %v434_v3  ;;  %v435_v5 = vld [vmem:[#allocation3 + $0x18] sm:$0xff] (%p406_p1)  ;;  %v436_v6 = vld [vmem:[#allocation3 + $0x20] sm:$0xff] (%p406_p1)  ;;  %vm1029_vm2 = vcmask (%p406_p1), 130048  }
  0x48   : > { %466 = vst.msk [vmem:[%s1615_s19 + $0x8] sm:$0xff] (%p406_p1), %vm448_vm0, %v433_v4  ;;  %v437_v7 = vld [vmem:[#allocation3 + $0x28] sm:$0xff] (%p406_p1)  ;;  %468 = vst.msk [vmem:[%s1615_s19 + $0x18] sm:$0xff] (%p406_p1), %vm448_vm0, %v435_v5  ;;  %v438_v8 = vld [vmem:[#allocation3 + $0x30] sm:$0xff] (%p406_p1)  ;;  %vm1078_vm3 = vcmask (%p406_p1), 7168  }
  0x49   : > { %469 = vst.msk [vmem:[%s1615_s19 + $0x20] sm:$0xff] (%p406_p1), %vm448_vm0, %v436_v6  ;;  %470 = vst.msk [vmem:[%s1615_s19 + $0x28] sm:$0xff] (%p406_p1), %vm448_vm0, %v437_v7  ;;  %v439_v9 = vld [vmem:[#allocation3 + $0x38] sm:$0xff] (%p406_p1)  ;;  %v1637_v10 = vld [vmem:[#allocation3 + $0x40] sm:$0xff] (%p406_p1) }
  0x4a   : > { %471 = vst.msk [vmem:[%s1615_s19 + $0x30] sm:$0xff] (%p406_p1), %vm448_vm0, %v438_v8  ;;  %472 = vst.msk [vmem:[%s1615_s19 + $0x38] sm:$0xff] (%p406_p1), %vm448_vm0, %v439_v9  ;;  %v1646_v11 = vld [vmem:[#allocation3 + $0x48] sm:$0xff] (%p406_p1)  ;;  %v1648_v12 = vld [vmem:[#allocation3 + $0x50] sm:$0xff] (%p406_p1) }
  0x4b   : > { %473 = vst.msk [vmem:[%s1615_s19 + $0x40] sm:$0xff] (%p406_p1), %vm448_vm0, %v1637_v10  ;;  %v1650_v13 = vld [vmem:[#allocation3 + $0x58] sm:$0xff] (%p406_p1)  ;;  %474 = vst.msk [vmem:[%s1615_s19 + $0x48] sm:$0xff] (%p406_p1), %vm448_vm0, %v1646_v11  ;;  %v1661_v14 = vld [vmem:[#allocation3 + $0x60] sm:$0xff] (%p406_p1)  ;;  %499 = vrot.lane.b32.xlu0 (%p406_p1), %v433_v4, %s1527_s28  ;;  %503 = vrot.lane.b32.xlu1 (%p406_p1), %v435_v5, %s1527_s28 }
  0x4c   : > { %475 = vst.msk [vmem:[%s1615_s19 + $0x50] sm:$0xff] (%p406_p1), %vm448_vm0, %v1648_v12  ;;  %476 = vst.msk [vmem:[%s1615_s19 + $0x58] sm:$0xff] (%p406_p1), %vm448_vm0, %v1650_v13  ;;  %v1663_v15 = vld [vmem:[#allocation3 + $0x68] sm:$0xff] (%p406_p1)  ;;  %v1665_v16 = vld [vmem:[#allocation3 + $0x70] sm:$0xff] (%p406_p1) }
  0x4d   : > { %477 = vst.msk [vmem:[%s1615_s19 + $0x60] sm:$0xff] (%p406_p1), %vm448_vm0, %v1661_v14  ;;  %478 = vst.msk [vmem:[%s1615_s19 + $0x68] sm:$0xff] (%p406_p1), %vm448_vm0, %v1663_v15  ;;  %v1678_v17 = vld [vmem:[#allocation3 + $0x78] sm:$0xff] (%p406_p1)  ;;  %v561_v18 = vld [vmem:[%s1982_s4] sm:$0xff] (%p406_p1) }
  0x4e   : > { %479 = vst.msk [vmem:[%s1615_s19 + $0x70] sm:$0xff] %vm448_vm0, %v1665_v16  ;;  %v562_v19 = vld [vmem:[%s1982_s4 + $0x8] sm:$0xff]  ;;  %480 = vst.msk [vmem:[%s1615_s19 + $0x78] sm:$0xff] %vm448_vm0, %v1678_v17  ;;  %v563_v21 = vld [vmem:[%s1982_s4 + $0x10] sm:$0xff] }
  0x4f   : > { %v1420_v20 = vpack.c.bf16 %v562_v19, %v561_v18  ;;  %v564_v22 = vld [vmem:[%s1982_s4 + $0x18] sm:$0xff]  ;;  %v565_v24 = vld [vmem:[%s1982_s4 + $0x20] sm:$0xff]  ;;  %v566_v25 = vld [vmem:[%s1982_s4 + $0x28] sm:$0xff]  ;;  %505 = vrot.lane.b32.xlu0 %v436_v6, %s1527_s28 }
  0x50   : > { %v1424_v23 = vpack.c.bf16 %v564_v22, %v563_v21  ;;  %v1701_v26 = vld [vmem:[#allocation2] sm:$0xff]  ;;  %v1703_v27 = vld [vmem:[#allocation2 + $0x10] sm:$0xff]  ;;  %v1705_v28 = vld [vmem:[#allocation2 + $0x8] sm:$0xff]  ;;  %507 = vrot.lane.b32.xlu1 %v437_v7, %s1527_s28  ;;  %v1428_v35 = vpack.c.bf16 %v566_v25, %v565_v24 }
  0x51   : > { %1421 = vmatprep.subr.bf16.mxu0 %v1420_v20  ;;  %449 = vst.msk [vmem:[%s1610_s16] sm:$0xff] %vm448_vm0, %v1701_v26  ;;  %451 = vst.msk [vmem:[%s1610_s16 + $0x10] sm:$0xff] %vm448_vm0, %v1703_v27  ;;  %v1718_v29 = vld [vmem:[#allocation2 + $0x18] sm:$0xff]  ;;  %v1720_v30 = vld [vmem:[#allocation2 + $0x20] sm:$0xff] }
  0x52   : > { %450 = vst.msk [vmem:[%s1610_s16 + $0x8] sm:$0xff] %vm448_vm0, %v1705_v28  ;;  %v1722_v31 = vld [vmem:[#allocation2 + $0x28] sm:$0xff]  ;;  %1423 = vmatpush3.bf16.msra.mxu0 %v1420_v20  ;;  %452 = vst.msk [vmem:[%s1610_s16 + $0x18] sm:$0xff] %vm448_vm0, %v1718_v29  ;;  %v1733_v32 = vld [vmem:[#allocation2 + $0x30] sm:$0xff] }
  0x53   : > { %453 = vst.msk [vmem:[%s1610_s16 + $0x20] sm:$0xff] %vm448_vm0, %v1720_v30  ;;  %454 = vst.msk [vmem:[%s1610_s16 + $0x28] sm:$0xff] %vm448_vm0, %v1722_v31  ;;  %v1735_v33 = vld [vmem:[#allocation2 + $0x38] sm:$0xff]  ;;  %v1737_v34 = vld [vmem:[#allocation2 + $0x40] sm:$0xff]  ;;  %1425 = vmatprep.subr.bf16.mxu0 %v1424_v23  ;;  %509 = vrot.lane.b32.xlu0 %v438_v8, %s1527_s28 }
  0x54   : > { %455 = vst.msk [vmem:[%s1610_s16 + $0x30] sm:$0xff] %vm448_vm0, %v1733_v32  ;;  %456 = vst.msk [vmem:[%s1610_s16 + $0x38] sm:$0xff] %vm448_vm0, %v1735_v33  ;;  %v1748_v36 = vld [vmem:[#allocation2 + $0x48] sm:$0xff]  ;;  %v1750_v37 = vld [vmem:[#allocation2 + $0x50] sm:$0xff]  ;;  %511 = vrot.lane.b32.xlu1 %v439_v9, %s1527_s28 }
  0x55   : > { %457 = vst.msk [vmem:[%s1610_s16 + $0x40] sm:$0xff] %vm448_vm0, %v1737_v34  ;;  %v1752_v38 = vld [vmem:[#allocation2 + $0x58] sm:$0xff]  ;;  %v567_v39 = vld [vmem:[%s1982_s4 + $0x30] sm:$0xff]  ;;  %458 = vst.msk [vmem:[%s1610_s16 + $0x48] sm:$0xff] %vm448_vm0, %v1748_v36 }
  0x56   : > { %v568_v40 = vld [vmem:[%s1982_s4 + $0x38] sm:$0xff]  ;;  %459 = vst.msk [vmem:[%s1610_s16 + $0x50] sm:$0xff] %vm448_vm0, %v1750_v37  ;;  %460 = vst.msk [vmem:[%s1610_s16 + $0x58] sm:$0xff] %vm448_vm0, %v1752_v38  ;;  %v1771_v41 = vld [vmem:[#allocation2 + $0x60] sm:$0xff]  ;;  %1427 = vmatpush3.bf16.msra.mxu0 %v1424_v23 }
  0x57   : > { %v1773_v42 = vld [vmem:[#allocation2 + $0x68] sm:$0xff]  ;;  %461 = vst.msk [vmem:[%s1610_s16 + $0x60] sm:$0xff] %vm448_vm0, %v1771_v41  ;;  %1429 = vmatprep.subr.bf16.mxu0 %v1428_v35  ;;  %v1432_v43 = vpack.c.bf16 %v568_v40, %v567_v39  ;;  %513 = vrot.lane.b32.xlu0 %v1637_v10, %s1527_s28  ;;  %v1785_v44 = vld [vmem:[#allocation2 + $0x70] sm:$0xff]  ;;  %v1787_v45 = vld [vmem:[#allocation2 + $0x78] sm:$0xff] }
  0x58   : > { %462 = vst.msk [vmem:[%s1610_s16 + $0x68] sm:$0xff] %vm448_vm0, %v1773_v42  ;;  %515 = vrot.lane.b32.xlu1 %v1646_v11, %s1527_s28  ;;  %463 = vst.msk [vmem:[%s1610_s16 + $0x70] sm:$0xff] %vm448_vm0, %v1785_v44  ;;  %v786_v46 = vld [vmem:[%s1984_s6] sm:$0xff] }
  0x59   : > { %464 = vst.msk [vmem:[%s1610_s16 + $0x78] sm:$0xff] %vm448_vm0, %v1787_v45  ;;  %v787_v47 = vld [vmem:[%s1984_s6 + $0x8] sm:$0xff]  ;;  %v789_v18 = vld [vmem:[%s1984_s6 + $0x18] sm:$0xff]  ;;  %v1265_v20 = vld [vmem:[%s1983_s5] ss:$0 sm:$0xff] }
  0x5a   : > { %1431 = vmatpush3.bf16.msra.mxu0 %v1428_v35  ;;  %v1436_v48 = vpack.c.bf16 %v787_v47, %v786_v46 }
  0x5b   : > { %1433 = vmatprep.subr.bf16.mxu0 %v1432_v43  ;;  %517 = vrot.lane.b32.xlu0 %v1648_v12, %s1527_s28 }
  0x5c   : > { %519 = vrot.lane.b32.xlu1 %v1650_v13, %s1527_s28  ;;  %1437 = vmatprep.subr.bf16.mxu1 %v1436_v48 }
  0x5d   : > { %1439 = vmatpush3.bf16.msra.mxu1 %v1436_v48 }
  0x5e   : > { %1435 = vmatpush3.bf16.msra.mxu0 %v1432_v43 }
  0x5f   : > { %521 = vrot.lane.b32.xlu0 %v1661_v14, %s1527_s28 }
  0x60   : > { %523 = vrot.lane.b32.xlu1 %v1663_v15, %s1527_s28 }
  0x63   : > { %525 = vrot.lane.b32.xlu0 %v1665_v16, %s1527_s28 }
  0x64   : > { %527 = vrot.lane.b32.xlu1 %v1678_v17, %s1527_s28  ;;  %v788_v17 = vld [vmem:[%s1984_s6 + $0x10] sm:$0xff] }
  0x65   : > { %v1440_v19 = vpack.c.bf16 %v789_v18, %v788_v17 }
  0x67   : > { %1441 = vmatprep.subr.bf16.mxu1 %v1440_v19 }
  0x68   : > { %1443 = vmatpush3.bf16.msra.mxu1 %v1440_v19 }
  0xb9   : > { %v498_v49 = vpop.permute.xlu0 %497  ;;  %v502_v50 = vpop.permute.xlu1 %501 }
  0xba   : > { %v545_v51 = vsel %vm448_vm0, %v1701_v26, %v498_v49  ;;  %v547_v52 = vsel %vm448_vm0, %v1703_v27, %v502_v50 }
  0xbb   : > { %1364 = vmatprep.mubr.msk.f32.mxu0 %vm576_vm1, %v545_v51 }
  0xbd   : > { %v500_v53 = vpop.permute.xlu0 %499  ;;  %v504_v54 = vpop.permute.xlu1 %503 }
  0xbe   : > { %v546_v55 = vsel %vm448_vm0, %v1705_v28, %v500_v53  ;;  %v548_v56 = vsel %vm448_vm0, %v1718_v29, %v504_v54 }
  0xbf   : > { %1365 = vmatmul.mubr.msk.f32.vlgmr.msra.gmra.mrb[0].mxu0 %vm576_vm1, %v546_v55 }
  0xc0   : > { %1367 = vmatprep.mubr.msk.f32.mxu0 %vm576_vm1, %v547_v52 }
  0xc1   : > { %v506_v57 = vpop.permute.xlu0 %505 }
  0xc2   : > { %v508_v58 = vpop.permute.xlu1 %507  ;;  %v549_v59 = vsel %vm448_vm0, %v1720_v30, %v506_v57 }
  0xc3   : > { %1368 = vmatmul.mubr.msk.f32.gmra.mrb[2].mxu0 %vm576_vm1, %v548_v56  ;;  %v550_v60 = vsel %vm448_vm0, %v1722_v31, %v508_v58 }
  0xc4   : > { %1370 = vmatprep.mubr.msk.f32.mxu0 %vm576_vm1, %v549_v59 }
  0xc5   : > { %v510_v61 = vpop.permute.xlu0 %509 }
  0xc6   : > { %v512_v62 = vpop.permute.xlu1 %511  ;;  %v551_v63 = vsel %vm448_vm0, %v1733_v32, %v510_v61 }
  0xc7   : > { %1371 = vmatmul.mubr.msk.f32.gmra.mrb[4].mxu0 %vm576_vm1, %v550_v60  ;;  %v552_v0 = vsel %vm448_vm0, %v1735_v33, %v512_v62 }
  0xc8   : > { %1373 = vmatprep.mubr.msk.f32.mxu0 %vm576_vm1, %v551_v63 }
  0xc9   : > { %v514_v1 = vpop.permute.xlu0 %513 }
  0xca   : > { %v516_v2 = vpop.permute.xlu1 %515  ;;  %v553_v3 = vsel %vm448_vm0, %v1737_v34, %v514_v1 }
  0xcb   : > { %1374 = vmatmul.mubr.msk.f32.gmra.mrb[6].mxu0 %vm576_vm1, %v552_v0  ;;  %v554_v4 = vsel %vm448_vm0, %v1748_v36, %v516_v2 }
  0xcc   : > { %1376 = vmatprep.mubr.msk.f32.mxu0 %vm576_vm1, %v553_v3 }
  0xcd   : > { %v518_v5 = vpop.permute.xlu0 %517 }
  0xce   : > { %v520_v6 = vpop.permute.xlu1 %519  ;;  %v555_v7 = vsel %vm448_vm0, %v1750_v37, %v518_v5  ;;  %v1889_v5 = vld [vmem:[%s1985_s7] ss:$0 sm:$0xff] }
  0xcf   : > { %1377 = vmatmul.mubr.msk.f32.gmra.mrb[8].mxu0 %vm576_vm1, %v554_v4  ;;  %v556_v8 = vsel %vm448_vm0, %v1752_v38, %v520_v6 }
  0xd0   : > { %1379 = vmatprep.mubr.msk.f32.mxu0 %vm576_vm1, %v555_v7 }
  0xd1   : > { %v522_v9 = vpop.permute.xlu0 %521 }
  0xd2   : > { %v524_v10 = vpop.permute.xlu1 %523  ;;  %v557_v11 = vsel %vm448_vm0, %v1771_v41, %v522_v9 }
  0xd3   : > { %1380 = vmatmul.mubr.msk.f32.gmra.mrb[10].mxu0 %vm576_vm1, %v556_v8  ;;  %v558_v12 = vsel %vm448_vm0, %v1773_v42, %v524_v10  ;;  %v1896_v10 = vld [vmem:[%s1986_s8] ss:$0 sm:$0xff] }
  0xd4   : > { %1382 = vmatprep.mubr.msk.f32.mxu0 %vm576_vm1, %v557_v11 }
  0xd5   : > { %v526_v13 = vpop.permute.xlu0 %525 }
  0xd6   : > { %v528_v14 = vpop.permute.xlu1 %527  ;;  %v559_v15 = vsel %vm448_vm0, %v1785_v44, %v526_v13 }
  0xd7   : > { %1383 = vmatmul.mubr.msk.f32.gmra.mrb[12].mxu0 %vm576_vm1, %v558_v12  ;;  %v560_v16 = vsel %vm448_vm0, %v1787_v45, %v528_v14 }
  0xd8   : > { %1385 = vmatprep.mubr.msk.f32.mxu0 %vm576_vm1, %v559_v15 }
  0xdb   : > { %1386 = vmatmul.mubr.msk.f32.gmra.mrb[14].mxu0 %vm576_vm1, %v560_v16 }
 0x192   : > { %v1366_v21 = vpop.f32.mrb[0].mxu0 }
 0x193   : > { %v697_v22 = vadd.f32 %v1366_v21, %v1265_v20  ;;  %v691_v23 = vpop.f32.mrb[1].mxu0 }
 0x194   : > { %v692_v24 = vadd.f32 %v1265_v20, %v691_v23 }
 0x195   : > { %v771_v27 = vmax.f32 %v697_v22, 0.0 }
 0x196   : > { %v770_v25 = vmax.f32 %v692_v24, 0.0  ;;  %v1369_v26 = vpop.f32.mrb[2].mxu0 }
 0x197   : > { %v707_v28 = vadd.f32 %v1369_v26, %v1265_v20  ;;  %v701_v29 = vpop.f32.mrb[3].mxu0 }
 0x198   : > { %v702_v30 = vadd.f32 %v1265_v20, %v701_v29  ;;  %1396 = vmatprep.mubr.msk.f32.mxu1 %vm448_vm0, %v770_v25 }
 0x199   : > { %v773_v31 = vmax.f32 %v707_v28, 0.0  ;;  %1397 = vmatmul.mubr.msk.f32.vlgmr.msra.gmra.mrb[0].mxu1 %vm448_vm0, %v771_v27 }
 0x19a   : > { %v772_v32 = vmax.f32 %v702_v30, 0.0  ;;  %v1372_v33 = vpop.f32.mrb[4].mxu0 }
 0x19b   : > { %v717_v34 = vadd.f32 %v1372_v33, %v1265_v20  ;;  %v711_v35 = vpop.f32.mrb[5].mxu0 }
 0x19c   : > { %v712_v36 = vadd.f32 %v1265_v20, %v711_v35  ;;  %1399 = vmatprep.mubr.msk.f32.mxu1 %vm448_vm0, %v772_v32 }
 0x19d   : > { %v775_v37 = vmax.f32 %v717_v34, 0.0  ;;  %1400 = vmatmul.mubr.msk.f32.gmra.mrb[2].mxu1 %vm448_vm0, %v773_v31 }
 0x19e   : > { %v774_v38 = vmax.f32 %v712_v36, 0.0  ;;  %v1375_v39 = vpop.f32.mrb[6].mxu0 }
 0x19f   : > { %v727_v40 = vadd.f32 %v1375_v39, %v1265_v20  ;;  %v721_v41 = vpop.f32.mrb[7].mxu0 }
 0x1a0   : > { %v722_v42 = vadd.f32 %v1265_v20, %v721_v41  ;;  %1402 = vmatprep.mubr.msk.f32.mxu1 %vm448_vm0, %v774_v38 }
 0x1a1   : > { %v777_v43 = vmax.f32 %v727_v40, 0.0  ;;  %1403 = vmatmul.mubr.msk.f32.gmra.mrb[4].mxu1 %vm448_vm0, %v775_v37 }
 0x1a2   : > { %v776_v44 = vmax.f32 %v722_v42, 0.0  ;;  %v1378_v45 = vpop.f32.mrb[8].mxu0 }
 0x1a3   : > { %v737_v46 = vadd.f32 %v1378_v45, %v1265_v20  ;;  %v731_v47 = vpop.f32.mrb[9].mxu0 }
 0x1a4   : > { %v732_v48 = vadd.f32 %v1265_v20, %v731_v47  ;;  %1405 = vmatprep.mubr.msk.f32.mxu1 %vm448_vm0, %v776_v44 }
 0x1a5   : > { %v779_v49 = vmax.f32 %v737_v46, 0.0  ;;  %1406 = vmatmul.mubr.msk.f32.gmra.mrb[6].mxu1 %vm448_vm0, %v777_v43 }
 0x1a6   : > { %v778_v50 = vmax.f32 %v732_v48, 0.0  ;;  %v1381_v51 = vpop.f32.mrb[10].mxu0 }
 0x1a7   : > { %v747_v52 = vadd.f32 %v1381_v51, %v1265_v20  ;;  %v741_v53 = vpop.f32.mrb[11].mxu0 }
 0x1a8   : > { %v742_v54 = vadd.f32 %v1265_v20, %v741_v53  ;;  %1408 = vmatprep.mubr.msk.f32.mxu1 %vm448_vm0, %v778_v50 }
 0x1a9   : > { %v781_v55 = vmax.f32 %v747_v52, 0.0  ;;  %1409 = vmatmul.mubr.msk.f32.gmra.mrb[8].mxu1 %vm448_vm0, %v779_v49 }
 0x1aa   : > { %v780_v56 = vmax.f32 %v742_v54, 0.0  ;;  %v1384_v57 = vpop.f32.mrb[12].mxu0 }
 0x1ab   : > { %v757_v58 = vadd.f32 %v1384_v57, %v1265_v20  ;;  %v751_v59 = vpop.f32.mrb[13].mxu0 }
 0x1ac   : > { %v752_v60 = vadd.f32 %v1265_v20, %v751_v59  ;;  %1411 = vmatprep.mubr.msk.f32.mxu1 %vm448_vm0, %v780_v56 }
 0x1ad   : > { %v783_v61 = vmax.f32 %v757_v58, 0.0  ;;  %1412 = vmatmul.mubr.msk.f32.gmra.mrb[10].mxu1 %vm448_vm0, %v781_v55 }
 0x1ae   : > { %v782_v62 = vmax.f32 %v752_v60, 0.0  ;;  %v1387_v63 = vpop.f32.mrb[14].mxu0 }
 0x1af   : > { %v767_v0 = vadd.f32 %v1387_v63, %v1265_v20  ;;  %v761_v1 = vpop.f32.mrb[15].mxu0 }
 0x1b0   : > { %v762_v2 = vadd.f32 %v1265_v20, %v761_v1  ;;  %1414 = vmatprep.mubr.msk.f32.mxu1 %vm448_vm0, %v782_v62 }
 0x1b1   : > { %v785_v3 = vmax.f32 %v767_v0, 0.0  ;;  %1415 = vmatmul.mubr.msk.f32.gmra.mrb[12].mxu1 %vm448_vm0, %v783_v61 }
 0x1b2   : > { %v784_v4 = vmax.f32 %v762_v2, 0.0 }
 0x1b4   : > { %1417 = vmatprep.mubr.msk.f32.mxu1 %vm448_vm0, %v784_v4 }
 0x1b5   : > { %1418 = vmatmul.mubr.msk.f32.gmra.mrb[14].mxu1 %vm448_vm0, %v785_v3 }
 0x26c   : > { %v1398_v6 = vpop.f32.mrb[0].mxu1 }
 0x26d   : > { %v917_v7 = vadd.f32 %v1398_v6, %v1889_v5  ;;  %v911_v8 = vpop.f32.mrb[1].mxu1 }
 0x26e   : > { %v912_v9 = vadd.f32 %v1889_v5, %v911_v8 }
 0x26f   : > { %v991_v11 = vmax.f32 %v917_v7, 0.0 }
 0x270   : > { %v990_v12 = vmax.f32 %v912_v9, 0.0  ;;  %v1401_v13 = vpop.f32.mrb[2].mxu1 }
 0x271   : > { %v927_v14 = vadd.f32 %v1401_v13, %v1889_v5  ;;  %v921_v15 = vpop.f32.mrb[3].mxu1  ;;  %v1014_v16 = vmul.f32 %v1896_v10, %v991_v11 }
 0x272   : > { %v922_v17 = vadd.f32 %v1889_v5, %v921_v15  ;;  %v1013_v18 = vmul.f32 %v1896_v10, %v990_v12 }
 0x273   : > { %v993_v19 = vmax.f32 %v927_v14, 0.0  ;;  %v1033_v20 = vsel %vm1029_vm2, %v1014_v16, 0.0 }
 0x274   : > { %v992_v21 = vmax.f32 %v922_v17, 0.0  ;;  %1034 = vadd.xlane.f32.xlu1 %v1033_v20  ;;  %v1404_v22 = vpop.f32.mrb[4].mxu1  ;;  %v1030_v23 = vsel %vm1029_vm2, %v1013_v18, 0.0 }
 0x275   : > { %v937_v24 = vadd.f32 %v1404_v22, %v1889_v5  ;;  %1031 = vadd.xlane.f32.xlu0 %v1030_v23  ;;  %v931_v25 = vpop.f32.mrb[5].mxu1  ;;  %v1016_v26 = vmul.f32 %v1896_v10, %v993_v19 }
 0x276   : > { %v932_v27 = vadd.f32 %v1889_v5, %v931_v25  ;;  %v1015_v32 = vmul.f32 %v1896_v10, %v992_v21 }
 0x277   : > { %v995_v28 = vmax.f32 %v937_v24, 0.0  ;;  %v1039_v29 = vsel %vm1029_vm2, %v1016_v26, 0.0 }
 0x278   : > { %v994_v30 = vmax.f32 %v932_v27, 0.0  ;;  %v1407_v31 = vpop.f32.mrb[6].mxu1  ;;  %v1036_v41 = vsel %vm1029_vm2, %v1015_v32, 0.0 }
 0x279   : > { %v947_v33 = vadd.f32 %v1407_v31, %v1889_v5  ;;  %1040 = vadd.xlane.f32.xlu0 %v1039_v29  ;;  %v941_v34 = vpop.f32.mrb[7].mxu1  ;;  %v1018_v37 = vmul.f32 %v1896_v10, %v995_v28 }
 0x27a   : > { %v942_v35 = vadd.f32 %v1889_v5, %v941_v34  ;;  %v1017_v36 = vmul.f32 %v1896_v10, %v994_v30 }
 0x27b   : > { %v997_v38 = vmax.f32 %v947_v33, 0.0  ;;  %v1045_v47 = vsel %vm1029_vm2, %v1018_v37, 0.0 }
 0x27c   : > { %v996_v39 = vmax.f32 %v942_v35, 0.0  ;;  %v1410_v40 = vpop.f32.mrb[8].mxu1  ;;  %v1042_v42 = vsel %vm1029_vm2, %v1017_v36, 0.0 }
 0x27d   : > { %v957_v43 = vadd.f32 %v1410_v40, %v1889_v5  ;;  %1037 = vadd.xlane.f32.xlu0 %v1036_v41  ;;  %v951_v44 = vpop.f32.mrb[9].mxu1  ;;  %1043 = vadd.xlane.f32.xlu1 %v1042_v42  ;;  %v1020_v52 = vmul.f32 %v1896_v10, %v997_v38 }
 0x27e   : > { %v952_v45 = vadd.f32 %v1889_v5, %v951_v44  ;;  %v1019_v46 = vmul.f32 %v1896_v10, %v996_v39 }
 0x27f   : > { %v999_v48 = vmax.f32 %v957_v43, 0.0  ;;  %v1051_v60 = vsel %vm1029_vm2, %v1020_v52, 0.0 }
 0x280   : > { %v998_v49 = vmax.f32 %v952_v45, 0.0  ;;  %v1413_v50 = vpop.f32.mrb[10].mxu1  ;;  %v1048_v51 = vsel %vm1029_vm2, %v1019_v46, 0.0 }
 0x281   : > { %v967_v53 = vadd.f32 %v1413_v50, %v1889_v5  ;;  %1046 = vadd.xlane.f32.xlu0 %v1045_v47  ;;  %v961_v54 = vpop.f32.mrb[11].mxu1  ;;  %1049 = vadd.xlane.f32.xlu1 %v1048_v51  ;;  %v1022_v62 = vmul.f32 %v1896_v10, %v999_v48 }
 0x282   : > { %v962_v55 = vadd.f32 %v1889_v5, %v961_v54  ;;  %v1021_v56 = vmul.f32 %v1896_v10, %v998_v49 }
 0x283   : > { %v1001_v57 = vmax.f32 %v967_v53, 0.0  ;;  %v1057_v8 = vsel %vm1029_vm2, %v1022_v62, 0.0 }
 0x284   : > { %v1000_v58 = vmax.f32 %v962_v55, 0.0  ;;  %v1416_v59 = vpop.f32.mrb[12].mxu1  ;;  %v1054_v61 = vsel %vm1029_vm2, %v1021_v56, 0.0 }
 0x285   : > { %v977_v63 = vadd.f32 %v1416_v59, %v1889_v5  ;;  %1052 = vadd.xlane.f32.xlu0 %v1051_v60  ;;  %v971_v0 = vpop.f32.mrb[13].mxu1  ;;  %1055 = vadd.xlane.f32.xlu1 %v1054_v61  ;;  %v1024_v3 = vmul.f32 %v1896_v10, %v1001_v57 }
 0x286   : > { %v972_v1 = vadd.f32 %v1889_v5, %v971_v0  ;;  %v1023_v2 = vmul.f32 %v1896_v10, %v1000_v58 }
 0x287   : > { %v1003_v4 = vmax.f32 %v977_v63, 0.0  ;;  %v1063_v15 = vsel %vm1029_vm2, %v1024_v3, 0.0 }
 0x288   : > { %v1002_v6 = vmax.f32 %v972_v1, 0.0  ;;  %v1419_v7 = vpop.f32.mrb[14].mxu1  ;;  %v1060_v9 = vsel %vm1029_vm2, %v1023_v2, 0.0 }
 0x289   : > { %v987_v11 = vadd.f32 %v1419_v7, %v1889_v5  ;;  %1058 = vadd.xlane.f32.xlu0 %v1057_v8  ;;  %v981_v12 = vpop.f32.mrb[15].mxu1  ;;  %1061 = vadd.xlane.f32.xlu1 %v1060_v9  ;;  %v1026_v19 = vmul.f32 %v1896_v10, %v1003_v4 }
 0x28a   : > { %v982_v13 = vadd.f32 %v1889_v5, %v981_v12  ;;  %v1025_v14 = vmul.f32 %v1896_v10, %v1002_v6 }
 0x28b   : > { %v1005_v16 = vmax.f32 %v987_v11, 0.0  ;;  %v1069_v21 = vsel %vm1029_vm2, %v1026_v19, 0.0 }
 0x28c   : > { %v1004_v17 = vmax.f32 %v982_v13, 0.0  ;;  %v1066_v18 = vsel %vm1029_vm2, %v1025_v14, 0.0 }
 0x28d   : > { %1064 = vadd.xlane.f32.xlu0 %v1063_v15  ;;  %1067 = vadd.xlane.f32.xlu1 %v1066_v18  ;;  %v1028_v22 = vmul.f32 %v1896_v10, %v1005_v16 }
 0x28e   : > { %v1027_v20 = vmul.f32 %v1896_v10, %v1004_v17 }
 0x28f   : > { %v1075_v23 = vsel %vm1029_vm2, %v1028_v22, 0.0 }
 0x290   : > { %v1072_v5 = vsel %vm1029_vm2, %v1027_v20, 0.0 }
 0x291   : > { %1070 = vadd.xlane.f32.xlu0 %v1069_v21  ;;  %1073 = vadd.xlane.f32.xlu1 %v1072_v5 }
 0x295   : > { %1076 = vadd.xlane.f32.xlu0 %v1075_v23 }
 0x301   : > { %v1035_v24 = vpop.xlane.xlu1 %1034 }
 0x302   : > { %1080 = vst.msk [vmem:[%s1605_s13 + $0x8] sm:$0xff] %vm1078_vm3, %v1035_v24  ;;  %v1032_v25 = vpop.xlane.xlu0 %1031 }
 0x303   : > { %1079 = vst.msk [vmem:[%s1605_s13] sm:$0xff] %vm1078_vm3, %v1032_v25 }
 0x306   : > { %v1041_v26 = vpop.xlane.xlu0 %1040 }
 0x307   : > { %1082 = vst.msk [vmem:[%s1605_s13 + $0x18] sm:$0xff] %vm1078_vm3, %v1041_v26 }
 0x30a   : > { %v1038_v10 = vpop.xlane.xlu0 %1037  ;;  %v1044_v27 = vpop.xlane.xlu1 %1043 }
 0x30b   : > { %1081 = vst.msk [vmem:[%s1605_s13 + $0x10] sm:$0xff] %vm1078_vm3, %v1038_v10  ;;  %1083 = vst.msk [vmem:[%s1605_s13 + $0x20] sm:$0xff] %vm1078_vm3, %v1044_v27 }
 0x30e   : > { %v1047_v28 = vpop.xlane.xlu0 %1046  ;;  %v1050_v29 = vpop.xlane.xlu1 %1049 }
 0x30f   : > { %1084 = vst.msk [vmem:[%s1605_s13 + $0x28] sm:$0xff] %vm1078_vm3, %v1047_v28  ;;  %1085 = vst.msk [vmem:[%s1605_s13 + $0x30] sm:$0xff] %vm1078_vm3, %v1050_v29 }
 0x312   : > { %v1053_v30 = vpop.xlane.xlu0 %1052  ;;  %v1056_v31 = vpop.xlane.xlu1 %1055 }
 0x313   : > { %1086 = vst.msk [vmem:[%s1605_s13 + $0x38] sm:$0xff] %vm1078_vm3, %v1053_v30  ;;  %1087 = vst.msk [vmem:[%s1605_s13 + $0x40] sm:$0xff] %vm1078_vm3, %v1056_v31 }
 0x316   : > { %v1059_v32 = vpop.xlane.xlu0 %1058  ;;  %v1062_v33 = vpop.xlane.xlu1 %1061 }
 0x317   : > { %1088 = vst.msk [vmem:[%s1605_s13 + $0x48] sm:$0xff] %vm1078_vm3, %v1059_v32  ;;  %1089 = vst.msk [vmem:[%s1605_s13 + $0x50] sm:$0xff] %vm1078_vm3, %v1062_v33 }
 0x31a   : > { %v1065_v34 = vpop.xlane.xlu0 %1064  ;;  %v1068_v35 = vpop.xlane.xlu1 %1067 }
 0x31b   : > { %1090 = vst.msk [vmem:[%s1605_s13 + $0x58] sm:$0xff] %vm1078_vm3, %v1065_v34  ;;  %1091 = vst.msk [vmem:[%s1605_s13 + $0x60] sm:$0xff] %vm1078_vm3, %v1068_v35 }
 0x31e   : > { %v1071_v36 = vpop.xlane.xlu0 %1070  ;;  %v1074_v37 = vpop.xlane.xlu1 %1073 }
 0x31f   : > { %1092 = vst.msk [vmem:[%s1605_s13 + $0x68] sm:$0xff] %vm1078_vm3, %v1071_v36  ;;  %1093 = vst.msk [vmem:[%s1605_s13 + $0x70] sm:$0xff] %vm1078_vm3, %v1074_v37 }
 0x322   : > { %v1077_v38 = vpop.xlane.xlu0 %1076 }
 0x323   : > { %1094 = vst.msk [vmem:[%s1605_s13 + $0x78] sm:$0xff] %vm1078_vm3, %v1077_v38 }
 0x324 PF: > { %s32_s1 = sadd.s32 1, %s1515_s1  }
 0x325   : > { %p29_p2 = scmp.ge.s32.totalorder %s32_s1, 6  }
 0x327   :  { %31 = sbr.rel (!%p29_p2) target bundleno = 26 (0x1a), region = 214 }
 0x32e   :  { %1151 = vsyncmov [#allocation4] }
 0x331   :  { %s1152_s27 = vpop.sfrf %1151 }
 0x332   :  { %p1302_p3 = scmp.ne.s32.totalorder %s1152_s27, 0 }
 0x334   :  { %1156 = shalt.err (%p1302_p3)  }
 0x335   :  { %1158 = vsyncmov [#allocation4 + $0x1] }
 0x338   :  { %s1159_s19 = vpop.sfrf %1158 }
 0x339   :  { %p1303_p4 = scmp.ne.s32.totalorder %s1159_s19, 0 }
 0x33b   :  { %1163 = shalt.err (%p1303_p4)  }

</bundles_post_ra>
